<compile_context>
chip_gen: v6e
topology: v6e:2x2x1
jax: 0.10.0
libtpu: 0.0.40
codegen_flags: <defaults>
</compile_context>

<pallas_src>
import functools

import jax
import jax.numpy as jnp
import numpy as np
from jax.experimental import pallas as pl
from jax.experimental.pallas import tpu as pltpu

_PAD_SENTINEL = 1.0e17  # squared ~1e34 << f32 max; dominates any real distance


def _round_up(x, m):
    return ((x + m - 1) // m) * m


def _pick_tk(K, N):
    """Largest K (lane) tile such that the per-step [N, TK] temp stays <= ~2MiB."""
    tk = 128
    for cand in (2048, 1024, 512, 256, 128):
        if N * cand * 4 <= (2 << 20):
            tk = cand
            break
    return min(tk, _round_up(K, 128))


def _pick_tb(B, N, TK):
    """Block several batch rows per grid step when per-batch work is tiny, but
    keep >= 2 steps on the parallel axis so both v7x TensorCores are used."""
    for cand in (8, 4, 2):
        if B % cand == 0 and B // cand >= 2 and cand * N * TK * 4 <= (2 << 20):
            return cand
    return 1


def _fused_kernel(ori_t_ref, adv_ref, advt_ref, out_ref, mink_ref, suml2_ref, *,
                  K, num_add, cl_num_p, tb, need_l1, need_l2):
    """Per-(batch-block, K-tile) fused loss terms.

    ori_t_ref: [TB, 3, TK]   original cloud, transposed (K lane-dense), this tile
    adv_ref  : [TB, N, 3]    adversarial (added-cluster) points
    advt_ref : [TB, 3, N]    same points transposed (rows for the far term)
    out_ref  : [TB, 1, 3]    packed (loss1_adv2ori, loss2_ori2adv, far)
    mink_ref : [TB, N, 1]    running min over K per adv point   (loss1 acc)
    suml2_ref: [TB, 1, 1]    running sum of per-ori-column mins (loss2 acc)
    """
    k = pl.program_id(1)
    tk = ori_t_ref.shape[2]

    @pl.when(k == 0)
    def _init():
        if need_l1:
            mink_ref[...] = jnp.full(mink_ref.shape, jnp.inf, mink_ref.dtype)
        if need_l2:
            suml2_ref[...] = jnp.zeros(suml2_ref.shape, suml2_ref.dtype)

    if need_l2:
        # Only the [1, TK] column-min row needs masking for sentinel-padded K.
        col_ids = jax.lax.broadcasted_iota(jnp.int32, (1, tk), 1) + k * tk
        col_valid = col_ids < K

    for t in range(tb):                     # tb is small & static
        adv = adv_ref[t]                    # [N, 3]   (N on sublanes)
        orit = ori_t_ref[t]                 # [3, TK]  (K tile on lanes)

        # d2[j, i] = ||adv_j - ori_i||^2, built with 3 broadcast-sub-square
        # VPU passes (contraction dim is 3 -> MXU would be ~2% utilized).
        d2 = None
        for c in range(3):
            diff = adv[:, c:c + 1] - orit[c:c + 1, :]       # [N,1]-[1,TK] -> [N,TK]
            sq = diff * diff
            d2 = sq if d2 is None else d2 + sq

        if need_l1:                                          # adv2ori direction
            tile_min = jnp.min(d2, axis=1, keepdims=True)    # [N, 1]
            mink_ref[t] = jnp.minimum(mink_ref[t], tile_min)
        if need_l2:                                          # ori2adv direction
            colmin = jnp.min(d2, axis=0, keepdims=True)      # [1, TK]
            colmin = jnp.where(col_valid, colmin, 0.0)       # drop padded cols
            suml2_ref[t] = suml2_ref[t] + jnp.sum(colmin, axis=1, keepdims=True)

    @pl.when(k == pl.num_programs(1) - 1)
    def _finalize():
        for t in range(tb):
            if need_l1:
                l1 = jnp.mean(mink_ref[t], axis=0, keepdims=True)      # [1,1]
            else:
                l1 = jnp.zeros((1, 1), jnp.float32)
            if need_l2:
                l2 = suml2_ref[t] * jnp.float32(1.0 / K)               # [1,1]
            else:
                l2 = jnp.zeros((1, 1), jnp.float32)

            # ---- farthest pairwise dist per added cluster (done once per b) --
            adv = adv_ref[t]                                  # [N, 3]
            advt = advt_ref[t]                                # [3, N]
            far = jnp.zeros((1, 1), jnp.float32)
            # num_add is small (1-3) for adding-cluster attacks: static unroll.
            for a in range(num_add):
                lo = a * cl_num_p
                d2c = None
                for c in range(3):
                    row = advt[c:c + 1, lo:lo + cl_num_p]     # [1, P] = pts[j, c]
                    col = adv[lo:lo + cl_num_p, c:c + 1]      # [P, 1] = pts[i, c]
                    diff = row - col + jnp.float32(1e-07)     # torch broadcast + eps
                    sq = diff * diff
                    d2c = sq if d2c is None else d2c + sq     # [P, P]
                m = jnp.max(jnp.max(d2c, axis=1, keepdims=True),
                            axis=0, keepdims=True)
                far = far + jnp.sqrt(m)                       # one sqrt per cluster

            out_ref[t, :, 0:1] = l1
            out_ref[t, :, 1:2] = l2
            out_ref[t, :, 2:3] = far


def far_chamfer_dist(adv_pc, ori_pc, *, num_add, chamfer_method="adv2ori",
                     chamfer_weight=0.1, weights=None, batch_avg=True):
    """JAX/Pallas equivalent of FarChamferDist.forward.

    adv_pc: [B, num_add * cl_num_p, 3]   ori_pc: [B, K, 3]
    """
    adv_pc = adv_pc.astype(jnp.float32)
    ori_pc = ori_pc.astype(jnp.float32)
    B, N, _ = adv_pc.shape
    K = ori_pc.shape[1]
    cl_num_p = N // num_add

    need_l1 = chamfer_method != "ori2adv"
    need_l2 = chamfer_method != "adv2ori"

    TK = _pick_tk(K, N)
    K_pad = _round_up(K, TK)
    nk = K_pad // TK
    TB = _pick_tb(B, N, TK)
    nb = B // TB

    # Wrapper-side layout plumbing (cheap): big K axis goes lane-dense; padded
    # with a far-away sentinel point so the in-kernel min over K needs no mask.
    ori_t = jnp.transpose(ori_pc, (0, 2, 1))                  # [B, 3, K]
    if K_pad != K:
        ori_t = jnp.pad(ori_t, ((0, 0), (0, 0), (0, K_pad - K)),
                        constant_values=_PAD_SENTINEL)        # [B, 3, K_pad]
    adv_t = jnp.transpose(adv_pc, (0, 2, 1))                  # [B, 3, N] (tiny)

    kernel = functools.partial(_fused_kernel, K=K, num_add=num_add,
                               cl_num_p=cl_num_p, tb=TB,
                               need_l1=need_l1, need_l2=need_l2)
    packed = pl.pallas_call(
        kernel,
        out_shape=jax.ShapeDtypeStruct((B, 1, 3), jnp.float32),
        grid=(nb, nk),
        in_specs=[pl.BlockSpec((TB, 3, TK), lambda b, k: (b, 0, k)),
                  pl.BlockSpec((TB, N, 3), lambda b, k: (b, 0, 0)),
                  pl.BlockSpec((TB, 3, N), lambda b, k: (b, 0, 0))],
        out_specs=pl.BlockSpec((TB, 1, 3), lambda b, k: (b, 0, 0)),
        scratch_shapes=[pltpu.VMEM((TB, N, 1), jnp.float32),
                        pltpu.VMEM((TB, 1, 1), jnp.float32)],
        compiler_params=pltpu.CompilerParams(
            # B-block axis shards across TensorCores; K-tile axis is a reduction.
            # No vmem_limit override: streaming keeps footprint << default limit.
            dimension_semantics=("parallel", "arbitrary")),
    )(ori_t, adv_pc, adv_t)

    packed = packed.reshape(B, 3)
    loss1, loss2, far = packed[:, 0], packed[:, 1], packed[:, 2]

    if chamfer_method == "adv2ori":
        chamfer = loss1
    elif chamfer_method == "ori2adv":
        chamfer = loss2
    else:
        chamfer = (loss1 + loss2) / 2.0

    if weights is None:
        weights = jnp.ones((B,), jnp.float32)
    weights = jnp.asarray(weights, jnp.float32)

    chamfer_loss = chamfer * weights
    far_loss = far * weights
    if batch_avg:
        chamfer_loss = chamfer_loss.mean()
        far_loss = far_loss.mean()
    return far_loss + chamfer_loss * chamfer_weight


def _reference_numpy(adv, ori, num_add, cd_w, method="adv2ori"):
    """Pure-numpy transcription of the PyTorch forward (weights=None, batch_avg)."""
    adv = adv.astype(np.float64)
    ori = ori.astype(np.float64)
    B = adv.shape[0]
    x, y = ori, adv                       # batch_pairwise_dist(gts=ori, preds=adv)
    rx = (x * x).sum(-1)                  # [B, K]
    ry = (y * y).sum(-1)                  # [B, N]
    zz = np.einsum("bik,bjk->bij", x, y)  # [B, K, N]
    P = rx[:, :, None] + ry[:, None, :] - 2.0 * zz
    loss1 = P.min(axis=1).mean(axis=1)    # adv2ori
    loss2 = P.min(axis=2).mean(axis=1)    # ori2adv
    if method == "adv2ori":
        chamfer = loss1
    elif method == "ori2adv":
        chamfer = loss2
    else:
        chamfer = (loss1 + loss2) / 2.0
    chamfer = chamfer.mean()

    cl = adv.reshape(B, num_add, -1, 3)
    delta = cl[:, :, None, :, :] - cl[:, :, :, None, :] + 1e-07
    norm = np.sqrt((delta ** 2).sum(-1))
    far = norm.max(axis=2).max(axis=2).sum(axis=1).mean()
    return far + chamfer * cd_w


if __name__ == "__main__":
    # Small shapes consistent with the module: 2 added clusters of 8 points,
    # K=20 original points (exercises the sentinel-padded last K tile).
    B, num_add, cl_num_p, K = 2, 2, 8, 20
    key = jax.random.PRNGKey(0)
    k1, k2 = jax.random.split(key)
    adv_pc = jax.random.normal(k1, (B, num_add * cl_num_p, 3), dtype=jnp.float32)
    ori_pc = jax.random.normal(k2, (B, K, 3), dtype=jnp.float32)

    for method in ("adv2ori", "ori2adv", "both"):
        out = far_chamfer_dist(adv_pc, ori_pc, num_add=num_add,
                               chamfer_method=method, chamfer_weight=0.1)
        out = jax.block_until_ready(out)
        ref = _reference_numpy(np.asarray(adv_pc), np.asarray(ori_pc),
                               num_add, 0.1, method=method)
        assert np.allclose(np.asarray(out), ref, rtol=1e-4, atol=1e-4), \
            (method, np.asarray(out), ref)

    print("KERNEL_OK")
</pallas_src>

<mosaic_0001>
module attributes {stable_mosaic.version = 11 : i64} {
  func.func @_fused_kernel(%arg0: i32, %arg1: i32, %arg2: memref<1x3x128xf32, #tpu.memory_space<vmem>>, %arg3: memref<1x16x3xf32, #tpu.memory_space<vmem>>, %arg4: memref<1x3x16xf32, #tpu.memory_space<vmem>>, %arg5: memref<1x1x3xf32, #tpu.memory_space<vmem>>, %arg6: memref<1x16x1xf32, #tpu.memory_space<vmem>>, %arg7: memref<1x1x1xf32, #tpu.memory_space<vmem>>) attributes {dimension_semantics = [#tpu.dimension_semantics<parallel>, #tpu.dimension_semantics<arbitrary>], iteration_bounds = array<i64: 2, 1>, scalar_prefetch = 0 : i64, scratch_operands = 2 : i64, tpu.core_type = #tpu.core_type<tc>, window_params = [{transform_indices = @transform_0, window_bounds = array<i64: 1, 3, 128>}, {transform_indices = @transform_1, window_bounds = array<i64: 1, 16, 3>}, {transform_indices = @transform_2, window_bounds = array<i64: 1, 3, 16>}, {transform_indices = @transform_3, window_bounds = array<i64: 1, 1, 3>}]} {
    %c0_i32 = arith.constant 0 : i32
    %0 = arith.cmpi eq, %arg1, %c0_i32 : i32
    %1 = arith.extui %0 : i1 to i32
    %c0_i32_0 = arith.constant 0 : i32
    %2 = arith.cmpi ne, %1, %c0_i32_0 : i32
    scf.if %2 {
      %cst_14 = arith.constant 0x7F800000 : f32
      %38 = vector.broadcast %cst_14 : f32 to vector<1x16x1xf32>
      %c0_15 = arith.constant 0 : index
      %c0_16 = arith.constant 0 : index
      %c0_17 = arith.constant 0 : index
      %39 = vector.load %arg6[%c0_15, %c0_16, %c0_17] : memref<1x16x1xf32, #tpu.memory_space<vmem>>, vector<1x16x1xf32>
      tpu.vector_store %arg6[%c0_15, %c0_16, %c0_17], %38 {strides = array<i32>} : memref<1x16x1xf32, #tpu.memory_space<vmem>>, vector<1x16x1xf32>,
    } else {
    }
    %c0 = arith.constant 0 : index
    %c0_1 = arith.constant 0 : index
    %c0_2 = arith.constant 0 : index
    %3 = vector.load %arg3[%c0, %c0_1, %c0_2] : memref<1x16x3xf32, #tpu.memory_space<vmem>>, vector<1x16x3xf32>
    %4 = vector.shape_cast %3 : vector<1x16x3xf32> to vector<16x3xf32>
    %c0_3 = arith.constant 0 : index
    %c0_4 = arith.constant 0 : index
    %c0_5 = arith.constant 0 : index
    %5 = vector.load %arg2[%c0_3, %c0_4, %c0_5] : memref<1x3x128xf32, #tpu.memory_space<vmem>>, vector<1x3x128xf32>
    %6 = vector.shape_cast %5 : vector<1x3x128xf32> to vector<3x128xf32>
    %7 = vector.extract_strided_slice %4 {offsets = [0, 0], sizes = [16, 1], strides = [1, 1]} : vector<16x3xf32> to vector<16x1xf32>
    %8 = vector.extract_strided_slice %6 {offsets = [0, 0], sizes = [1, 128], strides = [1, 1]} : vector<3x128xf32> to vector<1x128xf32>
    %9 = vector.broadcast %7 : vector<16x1xf32> to vector<16x128xf32>
    %10 = vector.broadcast %8 : vector<1x128xf32> to vector<16x128xf32>
    %11 = arith.subf %9, %10 : vector<16x128xf32>
    %12 = arith.mulf %11, %11 : vector<16x128xf32>
    %13 = vector.extract_strided_slice %4 {offsets = [0, 1], sizes = [16, 1], strides = [1, 1]} : vector<16x3xf32> to vector<16x1xf32>
    %14 = vector.extract_strided_slice %6 {offsets = [1, 0], sizes = [1, 128], strides = [1, 1]} : vector<3x128xf32> to vector<1x128xf32>
    %15 = vector.broadcast %13 : vector<16x1xf32> to vector<16x128xf32>
    %16 = vector.broadcast %14 : vector<1x128xf32> to vector<16x128xf32>
    %17 = arith.subf %15, %16 : vector<16x128xf32>
    %18 = arith.mulf %17, %17 : vector<16x128xf32>
    %19 = arith.addf %12, %18 : vector<16x128xf32>
    %20 = vector.extract_strided_slice %4 {offsets = [0, 2], sizes = [16, 1], strides = [1, 1]} : vector<16x3xf32> to vector<16x1xf32>
    %21 = vector.extract_strided_slice %6 {offsets = [2, 0], sizes = [1, 128], strides = [1, 1]} : vector<3x128xf32> to vector<1x128xf32>
    %22 = vector.broadcast %20 : vector<16x1xf32> to vector<16x128xf32>
    %23 = vector.broadcast %21 : vector<1x128xf32> to vector<16x128xf32>
    %24 = arith.subf %22, %23 : vector<16x128xf32>
    %25 = arith.mulf %24, %24 : vector<16x128xf32>
    %26 = arith.addf %19, %25 : vector<16x128xf32>
    %cst = arith.constant dense<0x7F800000> : vector<16xf32>
    %27 = vector.multi_reduction <minimumf>, %26, %cst [1] : vector<16x128xf32> to vector<16xf32>
    %28 = vector.shape_cast %27 : vector<16xf32> to vector<16x1xf32>
    %c0_6 = arith.constant 0 : index
    %c0_7 = arith.constant 0 : index
    %c0_8 = arith.constant 0 : index
    %29 = vector.load %arg6[%c0_6, %c0_7, %c0_8] : memref<1x16x1xf32, #tpu.memory_space<vmem>>, vector<1x16x1xf32>
    %30 = vector.shape_cast %29 : vector<1x16x1xf32> to vector<16x1xf32>
    %31 = arith.minimumf %30, %28 : vector<16x1xf32>
    %c0_9 = arith.constant 0 : index
    %c0_10 = arith.constant 0 : index
    %c0_11 = arith.constant 0 : index
    %32 = vector.load %arg6[%c0_9, %c0_10, %c0_11] : memref<1x16x1xf32, #tpu.memory_space<vmem>>, vector<1x16x1xf32>
    %33 = vector.shape_cast %32 : vector<1x16x1xf32> to vector<16x1xf32>
    %34 = vector.shape_cast %31 : vector<16x1xf32> to vector<1x16x1xf32>
    tpu.vector_store %arg6[%c0_9, %c0_10, %c0_11], %34 {strides = array<i32>} : memref<1x16x1xf32, #tpu.memory_space<vmem>>, vector<1x16x1xf32>,
    %c0_i32_12 = arith.constant 0 : i32
    %35 = arith.cmpi eq, %arg1, %c0_i32_12 : i32
    %36 = arith.extui %35 : i1 to i32
    %c0_i32_13 = arith.constant 0 : i32
    %37 = arith.cmpi ne, %36, %c0_i32_13 : i32
    scf.if %37 {
      %c0_14 = arith.constant 0 : index
      %c0_15 = arith.constant 0 : index
      %c0_16 = arith.constant 0 : index
      %38 = vector.load %arg6[%c0_14, %c0_15, %c0_16] : memref<1x16x1xf32, #tpu.memory_space<vmem>>, vector<1x16x1xf32>
      %39 = vector.shape_cast %38 : vector<1x16x1xf32> to vector<16x1xf32>
      %cst_17 = arith.constant dense<0.000000e+00> : vector<1xf32>
      %40 = vector.multi_reduction <add>, %39, %cst_17 [0] : vector<16x1xf32> to vector<1xf32>
      %41 = vector.shape_cast %40 : vector<1xf32> to vector<1x1xf32>
      %cst_18 = arith.constant 1.600000e+01 : f32
      %42 = vector.broadcast %cst_18 : f32 to vector<1x1xf32>
      %43 = arith.divf %41, %42 : vector<1x1xf32>
      %cst_19 = arith.constant 0.000000e+00 : f32
      %44 = vector.broadcast %cst_19 : f32 to vector<1x1xf32>
      %c0_20 = arith.constant 0 : index
      %c0_21 = arith.constant 0 : index
      %c0_22 = arith.constant 0 : index
      %45 = vector.load %arg3[%c0_20, %c0_21, %c0_22] : memref<1x16x3xf32, #tpu.memory_space<vmem>>, vector<1x16x3xf32>
      %46 = vector.shape_cast %45 : vector<1x16x3xf32> to vector<16x3xf32>
      %c0_23 = arith.constant 0 : index
      %c0_24 = arith.constant 0 : index
      %c0_25 = arith.constant 0 : index
      %47 = vector.load %arg4[%c0_23, %c0_24, %c0_25] : memref<1x3x16xf32, #tpu.memory_space<vmem>>, vector<1x3x16xf32>
      %48 = vector.shape_cast %47 : vector<1x3x16xf32> to vector<3x16xf32>
      %cst_26 = arith.constant 0.000000e+00 : f32
      %49 = vector.broadcast %cst_26 : f32 to vector<1x1xf32>
      %50 = vector.extract_strided_slice %48 {offsets = [0, 0], sizes = [1, 8], strides = [1, 1]} : vector<3x16xf32> to vector<1x8xf32>
      %51 = vector.extract_strided_slice %46 {offsets = [0, 0], sizes = [8, 1], strides = [1, 1]} : vector<16x3xf32> to vector<8x1xf32>
      %52 = vector.broadcast %50 : vector<1x8xf32> to vector<8x8xf32>
      %53 = vector.broadcast %51 : vector<8x1xf32> to vector<8x8xf32>
      %54 = arith.subf %52, %53 : vector<8x8xf32>
      %cst_27 = arith.constant 1.000000e-07 : f32
      %55 = vector.broadcast %cst_27 : f32 to vector<8x8xf32>
      %56 = arith.addf %54, %55 : vector<8x8xf32>
      %57 = arith.mulf %56, %56 : vector<8x8xf32>
      %58 = vector.extract_strided_slice %48 {offsets = [1, 0], sizes = [1, 8], strides = [1, 1]} : vector<3x16xf32> to vector<1x8xf32>
      %59 = vector.extract_strided_slice %46 {offsets = [0, 1], sizes = [8, 1], strides = [1, 1]} : vector<16x3xf32> to vector<8x1xf32>
      %60 = vector.broadcast %58 : vector<1x8xf32> to vector<8x8xf32>
      %61 = vector.broadcast %59 : vector<8x1xf32> to vector<8x8xf32>
      %62 = arith.subf %60, %61 : vector<8x8xf32>
      %cst_28 = arith.constant 1.000000e-07 : f32
      %63 = vector.broadcast %cst_28 : f32 to vector<8x8xf32>
      %64 = arith.addf %62, %63 : vector<8x8xf32>
      %65 = arith.mulf %64, %64 : vector<8x8xf32>
      %66 = arith.addf %57, %65 : vector<8x8xf32>
      %67 = vector.extract_strided_slice %48 {offsets = [2, 0], sizes = [1, 8], strides = [1, 1]} : vector<3x16xf32> to vector<1x8xf32>
      %68 = vector.extract_strided_slice %46 {offsets = [0, 2], sizes = [8, 1], strides = [1, 1]} : vector<16x3xf32> to vector<8x1xf32>
      %69 = vector.broadcast %67 : vector<1x8xf32> to vector<8x8xf32>
      %70 = vector.broadcast %68 : vector<8x1xf32> to vector<8x8xf32>
      %71 = arith.subf %69, %70 : vector<8x8xf32>
      %cst_29 = arith.constant 1.000000e-07 : f32
      %72 = vector.broadcast %cst_29 : f32 to vector<8x8xf32>
      %73 = arith.addf %71, %72 : vector<8x8xf32>
      %74 = arith.mulf %73, %73 : vector<8x8xf32>
      %75 = arith.addf %66, %74 : vector<8x8xf32>
      %cst_30 = arith.constant dense<0xFF800000> : vector<8xf32>
      %76 = vector.multi_reduction <maximumf>, %75, %cst_30 [1] : vector<8x8xf32> to vector<8xf32>
      %77 = vector.shape_cast %76 : vector<8xf32> to vector<8x1xf32>
      %cst_31 = arith.constant dense<0xFF800000> : vector<1xf32>
      %78 = vector.multi_reduction <maximumf>, %77, %cst_31 [0] : vector<8x1xf32> to vector<1xf32>
      %79 = vector.shape_cast %78 : vector<1xf32> to vector<1x1xf32>
      %80 = math.sqrt %79 : vector<1x1xf32>
      %81 = arith.addf %49, %80 : vector<1x1xf32>
      %82 = vector.extract_strided_slice %48 {offsets = [0, 8], sizes = [1, 8], strides = [1, 1]} : vector<3x16xf32> to vector<1x8xf32>
      %83 = vector.extract_strided_slice %46 {offsets = [8, 0], sizes = [8, 1], strides = [1, 1]} : vector<16x3xf32> to vector<8x1xf32>
      %84 = vector.broadcast %82 : vector<1x8xf32> to vector<8x8xf32>
      %85 = vector.broadcast %83 : vector<8x1xf32> to vector<8x8xf32>
      %86 = arith.subf %84, %85 : vector<8x8xf32>
      %cst_32 = arith.constant 1.000000e-07 : f32
      %87 = vector.broadcast %cst_32 : f32 to vector<8x8xf32>
      %88 = arith.addf %86, %87 : vector<8x8xf32>
      %89 = arith.mulf %88, %88 : vector<8x8xf32>
      %90 = vector.extract_strided_slice %48 {offsets = [1, 8], sizes = [1, 8], strides = [1, 1]} : vector<3x16xf32> to vector<1x8xf32>
      %91 = vector.extract_strided_slice %46 {offsets = [8, 1], sizes = [8, 1], strides = [1, 1]} : vector<16x3xf32> to vector<8x1xf32>
      %92 = vector.broadcast %90 : vector<1x8xf32> to vector<8x8xf32>
      %93 = vector.broadcast %91 : vector<8x1xf32> to vector<8x8xf32>
      %94 = arith.subf %92, %93 : vector<8x8xf32>
      %cst_33 = arith.constant 1.000000e-07 : f32
      %95 = vector.broadcast %cst_33 : f32 to vector<8x8xf32>
      %96 = arith.addf %94, %95 : vector<8x8xf32>
      %97 = arith.mulf %96, %96 : vector<8x8xf32>
      %98 = arith.addf %89, %97 : vector<8x8xf32>
      %99 = vector.extract_strided_slice %48 {offsets = [2, 8], sizes = [1, 8], strides = [1, 1]} : vector<3x16xf32> to vector<1x8xf32>
      %100 = vector.extract_strided_slice %46 {offsets = [8, 2], sizes = [8, 1], strides = [1, 1]} : vector<16x3xf32> to vector<8x1xf32>
      %101 = vector.broadcast %99 : vector<1x8xf32> to vector<8x8xf32>
      %102 = vector.broadcast %100 : vector<8x1xf32> to vector<8x8xf32>
      %103 = arith.subf %101, %102 : vector<8x8xf32>
      %cst_34 = arith.constant 1.000000e-07 : f32
      %104 = vector.broadcast %cst_34 : f32 to vector<8x8xf32>
      %105 = arith.addf %103, %104 : vector<8x8xf32>
      %106 = arith.mulf %105, %105 : vector<8x8xf32>
      %107 = arith.addf %98, %106 : vector<8x8xf32>
      %cst_35 = arith.constant dense<0xFF800000> : vector<8xf32>
      %108 = vector.multi_reduction <maximumf>, %107, %cst_35 [1] : vector<8x8xf32> to vector<8xf32>
      %109 = vector.shape_cast %108 : vector<8xf32> to vector<8x1xf32>
      %cst_36 = arith.constant dense<0xFF800000> : vector<1xf32>
      %110 = vector.multi_reduction <maximumf>, %109, %cst_36 [0] : vector<8x1xf32> to vector<1xf32>
      %111 = vector.shape_cast %110 : vector<1xf32> to vector<1x1xf32>
      %112 = math.sqrt %111 : vector<1x1xf32>
      %113 = arith.addf %81, %112 : vector<1x1xf32>
      %c0_37 = arith.constant 0 : index
      %c0_38 = arith.constant 0 : index
      %c0_39 = arith.constant 0 : index
      %114 = vector.load %arg5[%c0_37, %c0_38, %c0_39] : memref<1x1x3xf32, #tpu.memory_space<vmem>>, vector<1x1x1xf32>
      %115 = vector.shape_cast %114 : vector<1x1x1xf32> to vector<1x1xf32>
      %116 = vector.shape_cast %43 : vector<1x1xf32> to vector<1x1x1xf32>
      tpu.vector_store %arg5[%c0_37, %c0_38, %c0_39], %116 {strides = array<i32>} : memref<1x1x3xf32, #tpu.memory_space<vmem>>, vector<1x1x1xf32>,
      %c0_40 = arith.constant 0 : index
      %c0_41 = arith.constant 0 : index
      %c1 = arith.constant 1 : index
      %117 = vector.load %arg5[%c0_40, %c0_41, %c1] : memref<1x1x3xf32, #tpu.memory_space<vmem>>, vector<1x1x1xf32>
      %118 = vector.shape_cast %117 : vector<1x1x1xf32> to vector<1x1xf32>
      %119 = vector.shape_cast %44 : vector<1x1xf32> to vector<1x1x1xf32>
      tpu.vector_store %arg5[%c0_40, %c0_41, %c1], %119 {strides = array<i32>} : memref<1x1x3xf32, #tpu.memory_space<vmem>>, vector<1x1x1xf32>,
      %c0_42 = arith.constant 0 : index
      %c0_43 = arith.constant 0 : index
      %c2 = arith.constant 2 : index
      %120 = vector.load %arg5[%c0_42, %c0_43, %c2] : memref<1x1x3xf32, #tpu.memory_space<vmem>>, vector<1x1x1xf32>
      %121 = vector.shape_cast %120 : vector<1x1x1xf32> to vector<1x1xf32>
      %122 = vector.shape_cast %113 : vector<1x1xf32> to vector<1x1x1xf32>
      tpu.vector_store %arg5[%c0_42, %c0_43, %c2], %122 {strides = array<i32>} : memref<1x1x3xf32, #tpu.memory_space<vmem>>, vector<1x1x1xf32>,
    } else {
    }
    return
  }
  func.func @transform_0(%arg0: i32, %arg1: i32) -> (i32, i32, i32) {
    %c0_i32 = arith.constant 0 : i32
    %c0_i32_0 = arith.constant 0 : i32
    return %arg0, %c0_i32, %arg1 : i32, i32, i32
  }
  func.func @transform_1(%arg0: i32, %arg1: i32) -> (i32, i32, i32) {
    %c0_i32 = arith.constant 0 : i32
    %c0_i32_0 = arith.constant 0 : i32
    %c0_i32_1 = arith.constant 0 : i32
    return %arg0, %c0_i32, %c0_i32_0 : i32, i32, i32
  }
  func.func @transform_2(%arg0: i32, %arg1: i32) -> (i32, i32, i32) {
    %c0_i32 = arith.constant 0 : i32
    %c0_i32_0 = arith.constant 0 : i32
    %c0_i32_1 = arith.constant 0 : i32
    return %arg0, %c0_i32, %c0_i32_0 : i32, i32, i32
  }
  func.func @transform_3(%arg0: i32, %arg1: i32) -> (i32, i32, i32) {
    %c0_i32 = arith.constant 0 : i32
    %c0_i32_0 = arith.constant 0 : i32
    %c0_i32_1 = arith.constant 0 : i32
    return %arg0, %c0_i32, %c0_i32_0 : i32, i32, i32
  }
}

</mosaic_0001>

<bundles_post_ra>
// kernel: tpu_custom_call.1
= control target key start
LH: loop header
LB: loop body
LE: loop exit
PB: predicated region body
PF: predicated region fallthrough
CT: control target
= control target key end

     0   :  { %8 = vsyncpa [#allocation5], 0  ;;  %s846_s0 = inlined_call_operand.vmem [shape: f32[2,3,128], index: 0, kind: input, shape index: {}]   ;;  %s847_s1 = inlined_call_operand.vmem [shape: f32[2,16,3], index: 1, kind: input, shape index: {}]   ;;  %s848_s2 = inlined_call_operand.vmem [shape: f32[2,3,16], index: 2, kind: input, shape index: {}]   ;;  %s849_s3 = inlined_call_operand.hbm [shape: f32[2,1,3], index: 3, kind: output, shape index: {}]  }
   0x1   :  { %10 = vsyncpa [#allocation5 + $0x1], 0  ;;  %s715_s12 = smov 0   ;;  %s717_s13 = smov 0  }
   0x2   :  { %s719_s14 = smov 0   ;;  %s721_s15 = smov 0  }
   0x3   :  { %s723_s16 = smov 0   ;;  %s725_s17 = smov 0  }
   0x4 LB: > { %s524_s18 = sadd.s32 4294967295, %s687_s17   ;;  %s525_s19 = sadd.s32 4294967294, %s687_s17   ;;  %s687_s17 = sphi %s725_s17, %s16_s17   ;;  %s683_s16 = sphi %s723_s16, %s856_s16   ;;  %s679_s15 = sphi %s721_s15, %s855_s15   ;;  %s675_s14 = sphi %s719_s14, %s854_s14   ;;  %s671_s13 = sphi %s717_s13, %s853_s13   ;;  %s667_s12 = sphi %s715_s12, %s852_s12  }
   0x5   : > { %s28_s20 = sadd.s32 1, %s683_s16  ;;  %s115_s21 = sadd.s32 1, %s675_s14 }
   0x6   : > { %p30_p0 = scmp.ge.s32.totalorder %s28_s20, 2  ;;  %p125_p1 = scmp.ne.s32.totalorder %s675_s14, %s671_s13 }
   0x7   : > { %p126_p2 = scmp.eq.s32.totalorder %s524_s18, 1  ;;  %p131_p3 = scmp.ne.s32.totalorder %s671_s13, %s667_s12 }
   0x8   : > { %s858_s20 = smov (%p30_p0, %s28_s20), 0  ;;  %p132_p5 = scmp.eq.s32.totalorder %s525_s19, 1 }
   0x9   : > { %p755_p4 = por %p126_p2, %p125_p1  ;;  %s112_s23 = ssub.s32 %s683_s16, %s858_s20 }
   0xa   : > { %p528_p6 = scmp.ge.s32.totalorder %s687_s17, 1  ;;  %p113_p7 = scmp.eq.s32.totalorder %s112_s23, 0 }
   0xb   : > { %p762_p8 = por %p132_p5, %p131_p3  ;;  %p175_p9 = scmp.lt.s32.totalorder %s687_s17, 3 }
   0xc   : > { %s768_s25 = scalar_select %p113_p7, %s675_s14, %s115_s21  }
   0xd   : > { %p176_p10 = pnand %p528_p6, %p175_p9 }
   0xe   : > { %p209_p11 = scmp.lt.s32.totalorder (!%p176_p10), %s679_s15, 1  ;;  %s207_s11 = sand.u32 (!%p176_p10), 1, %s671_s13  }
   0xf   : > { %179 = sbr.rel (%p176_p10) target bundleno = 364 (0x16c), region = 32  ;;  %s533_s18 = sshll.u32 (!%p176_p10), %s679_s15, 4 }
  0x10   : > { %s208_s19 = scalar_lea.vmem (!%p176_p10), [#allocation4], %s207_s11  ;;  %s694_s29 = smov (!%p176_p10), [#allocation4]  }
  0x11   : > { %s434_s21 = sshll.u32 (!%p176_p10), %s208_s19, 4  ;;  %s802_s21 = int_to_ptr.vmem [resolvable:$true] %s434_s21 }
  0x12   : > { %s611_s28 = scalar_lea.vmem (!%p176_p10), %s802_s21, 16 }
  0x13   : > { %p612_p12 = scmp.ne.s32.totalorder (!%p176_p10), %s802_s21, %s611_s28 }
  0x14   : > { %v689_v0 = vmov 0   ;;  %s772_s26 = scalar_select %p209_p11, %s679_s15, 1  ;;  %v690_v3 = vmov 1   ;;  %v691_v4 = vmov 2   ;;  %v245_v5 = vlaneseq }
  0x15   : > { %598 = vset.pattern.permute.xlu1 %v689_v0  ;;  %597 = vset.pattern.permute.xlu0 %v689_v0  ;;  %vm397_vm0 = vcmask 130112   ;;  %vm355_vm1 = vcmask 64512   ;;  %vm229_vm2 = vcmask 7168   ;;  %vm415_vm6 = vcmask 0   ;;  %s422_s15 = scalar_lea.sflag [#allocation5], %s207_s11  ;;  %p613_p13 = pnand %p612_p12, %p755_p4 }
  0x16   : > { %s536_s27 = sshll.u32 %s772_s26, 4  ;;  %s529_s4 = sshll.u32 %s772_s26, 2  ;;  %v246_v6 = vshrl.u32 %v245_v5, 7  ;;  %vm417_vm8 = vcmask 8200   ;;  %vm419_vm9 = vcmask 16400  }
  0x17   : > { %s220_s30 = scalar_lea.vmem %s847_s1, %s536_s27  ;;  %s224_s7 = scalar_lea.vmem %s848_s2, %s529_s4 }
  0x18   : > { %v317_v1 = vld [vmem:[%s220_s30 + $0x8] sm:$0xff]  ;;  %v316_v2 = vld [vmem:[%s220_s30] sm:$0xff]  ;;  %v247_v7 = vsub.s32 0, %v246_v6  ;;  %v263_v10 = vsub.s32 1, %v246_v6  ;;  %v281_v11 = vsub.s32 2, %v246_v6  ;;  %s215_s10 = scalar_lea.vmem %s846_s0, %s529_s4  ;;  %v692_v6 = vmov inf   ;;  %s800_s27 = scalar_lea.hbm %s849_s3, %s533_s18 }
  0x19   : > { %375 = vperm.xlu1 %598, %v317_v1   ;;  %325 = vperm.xlu0 %597, %v316_v2   ;;  %v318_v8 = vld [vmem:[%s224_s7] sm:$0x7]  ;;  %231 = vst.msk [vmem:[#allocation2 + $0x8] sm:$0xff] %vm229_vm2, %v692_v6  ;;  %230 = vst.msk [vmem:[#allocation2] sm:$0xff] %vm229_vm2, %v692_v6  ;;  %p614_p0 = pneg %p613_p13  ;;  %s615_s30 = sshll.u32 %s694_s29, 4  ;;  %s616_s30 = int_to_ptr.vmem [resolvable:$false] %s615_s30 }
  0x1a   : > { %v322_v9 = vrot.slane %v318_v8, %v247_v7  ;;  %v334_v15 = vrot.slane %v318_v8, %v263_v10  ;;  %v346_v16 = vrot.slane %v318_v8, %v281_v11  ;;  %v234_v44 = vld [vmem:[%s215_s10] sm:$0x7]  ;;  %s617_s4 = scalar_lea.vmem %s616_s30, 32  ;;  %p618_p1 = scmp.lt.s32.totalorder %s802_s21, %s616_s30 }
  0x1b   : > { %v282_v47 = vrot.slane %v234_v44, %v281_v11  ;;  %v264_v48 = vrot.slane %v234_v44, %v263_v10  ;;  %v248_v49 = vrot.slane %v234_v44, %v247_v7  ;;  %p619_p2 = scmp.lt.s32.totalorder %s617_s4, %s611_s28 }
  0x1d   : > { %599 = vset.pattern.permute.xlu1 %v690_v3  ;;  %601 = vset.pattern.permute.xlu0 %v691_v4  ;;  %p620_p3 = por %p619_p2, %p618_p1 }
  0x1e   : > { %382 = vperm.xlu1 %599, %v317_v1   ;;  %390 = vperm.xlu0 %601, %v317_v1  }
  0x1f   : > { %p621_p5 = pnand %p620_p3, %p614_p0 }
  0x22   : > { %600 = vset.pattern.permute.xlu1 %v691_v4  ;;  %602 = vset.pattern.permute.xlu0 %v690_v3 }
  0x23   : > { %348 = vperm.xlu1 %600, %v316_v2   ;;  %336 = vperm.xlu0 %602, %v316_v2  }
  0x27   : > { %603 = vset.pattern.permute.xlu1 %v689_v0  ;;  %254 = vperm.xlu0 %602, %v316_v2  }
  0x28   : > { %237 = vperm.xlu1 %603, %v316_v2  }
  0x2b   : > { %606 = vset.pattern.permute.xlu0 %v691_v4 }
  0x2c   : > { %242 = vperm.xlu1 %603, %v317_v1   ;;  %276 = vperm.xlu0 %606, %v317_v1  }
  0x30   : > { %604 = vset.pattern.permute.xlu1 %v690_v3 }
  0x31   : > { %258 = vperm.xlu1 %604, %v317_v1  }
  0x35   : > { %605 = vset.pattern.permute.xlu1 %v691_v4 }
  0x36   : > { %272 = vperm.xlu1 %605, %v316_v2  }
  0x94   : > { %v376_v12 = vpop.permute.xlu1 %375  ;;  %v326_v13 = vpop.permute.xlu0 %325 }
  0x95   : > { %v378_v14 = vsub.f32 %v322_v9, %v376_v12  ;;  %v328_v17 = vsub.f32 %v322_v9, %v326_v13 }
  0x97   : > { %v379_v20 = vadd.f32 1e-07, %v378_v14  ;;  %v329_v25 = vadd.f32 1e-07, %v328_v17 }
  0x99   : > { %v383_v18 = vpop.permute.xlu1 %382  ;;  %v391_v19 = vpop.permute.xlu0 %390  ;;  %v380_v26 = vmul.f32 %v379_v20, %v379_v20  ;;  %v330_v34 = vmul.f32 %v329_v25, %v329_v25 }
  0x9a   : > { %v385_v21 = vsub.f32 %v334_v15, %v383_v18  ;;  %v393_v22 = vsub.f32 %v346_v16, %v391_v19  ;;  %v294_v18 = vld [vmem:[#allocation2 + $0x8] sm:$0xff] }
  0x9c   : > { %v386_v23 = vadd.f32 1e-07, %v385_v21  ;;  %v394_v24 = vadd.f32 1e-07, %v393_v22 }
  0x9e   : > { %v387_v27 = vmul.f32 %v386_v23, %v386_v23  ;;  %v395_v28 = vmul.f32 %v394_v24, %v394_v24  ;;  %v349_v29 = vpop.permute.xlu1 %348  ;;  %v337_v30 = vpop.permute.xlu0 %336  ;;  %v293_v23 = vld [vmem:[#allocation2] sm:$0xff] }
  0x9f   : > { %v351_v31 = vsub.f32 %v346_v16, %v349_v29  ;;  %v339_v32 = vsub.f32 %v334_v15, %v337_v30 }
  0xa0   : > { %v388_v33 = vadd.f32 %v387_v27, %v380_v26 }
  0xa1   : > { %v352_v35 = vadd.f32 1e-07, %v351_v31  ;;  %v340_v36 = vadd.f32 1e-07, %v339_v32 }
  0xa2   : > { %v396_v37 = vadd.f32 %v395_v28, %v388_v33  ;;  %v255_v40 = vpop.permute.xlu0 %254 }
  0xa3   : > { %v341_v38 = vmul.f32 %v340_v36, %v340_v36  ;;  %v238_v39 = vpop.permute.xlu1 %237  ;;  %v353_v42 = vmul.f32 %v352_v35, %v352_v35  ;;  %v265_v54 = vsub.f32 %v255_v40, %v264_v48 }
  0xa4   : > { %v398_v41 = vsel %vm397_vm0, %v396_v37, -inf  ;;  %v249_v55 = vsub.f32 %v238_v39, %v248_v49 }
  0xa5   : > { %v342_v43 = vadd.f32 %v341_v38, %v330_v34  ;;  %399 = vmax.xlane.f32.xlu0 %v398_v41  ;;  %v267_v61 = vmul.f32 %v265_v54, %v265_v54 }
  0xa6   : > { %v251_v62 = vmul.f32 %v249_v55, %v249_v55 }
  0xa7   : > { %v243_v45 = vpop.permute.xlu1 %242  ;;  %v354_v46 = vadd.f32 %v353_v42, %v342_v43  ;;  %v277_v50 = vpop.permute.xlu0 %276 }
  0xa8   : > { %v250_v52 = vsub.f32 %v243_v45, %v248_v49  ;;  %v284_v53 = vsub.f32 %v277_v50, %v282_v47  ;;  %v269_v3 = vadd.f32 %v267_v61, %v251_v62  ;;  %v693_v50 = vmov 0.0  }
  0xa9   : > { %v356_v51 = vsel %vm355_vm1, %v354_v46, -inf }
  0xaa   : > { %357 = vmax.xlane.f32.xlu1 %v356_v51  ;;  %v252_v58 = vmul.f32 %v250_v52, %v250_v52  ;;  %v286_v60 = vmul.f32 %v284_v53, %v284_v53 }
  0xac   : > { %v259_v56 = vpop.permute.xlu1 %258 }
  0xad   : > { %v266_v57 = vsub.f32 %v259_v56, %v264_v48 }
  0xaf   : > { %v268_v59 = vmul.f32 %v266_v57, %v266_v57 }
  0xb1   : > { %v270_v63 = vadd.f32 %v268_v59, %v252_v58  ;;  %v273_v0 = vpop.permute.xlu1 %272 }
  0xb2   : > { %v283_v1 = vsub.f32 %v273_v0, %v282_v47 }
  0xb3   : > { %v288_v2 = vadd.f32 %v286_v60, %v270_v63 }
  0xb4   : > { %v285_v4 = vmul.f32 %v283_v1, %v283_v1 }
  0xb5   : > { %291 = vmin.xlane.f32.xlu0 %v288_v2 }
  0xb6   : > { %v287_v5 = vadd.f32 %v285_v4, %v269_v3 }
  0xb8   : > { %289 = vmin.xlane.f32.xlu1 %v287_v5 }
 0x12e   : > { %v400_v7 = vpop.xlane.xlu0 %399 }
 0x12f   : > { %v401_v8 = vrot.slane %v400_v7, 4 }
 0x131   : > { %v402_v9 = vmax.f32 %v400_v7, %v401_v8 }
 0x133   : > { %v358_v10 = vpop.xlane.xlu1 %357  ;;  %v403_v12 = vrot.slane %v402_v9, 2 }
 0x134   : > { %v359_v11 = vrot.slane %v358_v10, 4 }
 0x135   : > { %v404_v15 = vmax.f32 %v402_v9, %v403_v12 }
 0x136   : > { %v360_v13 = vmax.f32 %v358_v10, %v359_v11 }
 0x137   : > { %v405_v19 = vrot.slane %v404_v15, 1 }
 0x138   : > { %v361_v14 = vrot.slane %v360_v13, 2 }
 0x139   : > { %v406_v24 = vmax.f32 %v404_v15, %v405_v19 }
 0x13a   : > { %v362_v16 = vmax.f32 %v360_v13, %v361_v14 }
 0x13b   : > { %vm409_vm4 = vcmp.eq.f32.partialorder %v406_v24, inf  ;;  %v412_v46 = vand.u32 2147483648, %v406_v24  ;;  %vm411_vm7 = vcmp.eq.f32.partialorder %v406_v24, 0.0 }
 0x13c   : > { %v363_v17 = vrot.slane %v362_v16, 1 }
 0x13e   : > { %v292_v20 = vpop.xlane.xlu0 %291  ;;  %v364_v21 = vmax.f32 %v362_v16, %v363_v17 }
 0x13f   : > { %v296_v22 = vmin.f32 %v294_v18, %v292_v20 }
 0x140   : > { %607 = vrsqrt.f32 %v364_v21  ;;  %vm367_vm3 = vcmp.eq.f32.partialorder %v364_v21, inf  ;;  %v370_v42 = vand.u32 2147483648, %v364_v21  ;;  %vm369_vm5 = vcmp.eq.f32.partialorder %v364_v21, 0.0 }
 0x141   : > { %299 = vst.msk [vmem:[#allocation2 + $0x8] sm:$0xff] %vm229_vm2, %v296_v22  ;;  %v290_v25 = vpop.xlane.xlu1 %289  ;;  %609 = vrsqrt.f32 %v406_v24 }
 0x142   : > { %v295_v26 = vmin.f32 %v293_v23, %v290_v25 }
 0x144   : > { %298 = vst.msk [vmem:[#allocation2] sm:$0xff] %vm229_vm2, %v295_v26 }
 0x148   : > { %v304_v27 = vld [vmem:[#allocation2 + $0x8] sm:$0xff] }
 0x149   : > { %v306_v30 = vsel %vm229_vm2, %v304_v27, 0.0 }
 0x14b   : > { %v303_v28 = vld [vmem:[#allocation2] sm:$0xff] }
 0x14c   : > { %v305_v29 = vsel %vm229_vm2, %v303_v28, 0.0 }
 0x14d   : > { %v307_v31 = vadd.f32 %v306_v30, %v305_v29  ;;  %v608_v33 = vpop.eup %607 }
 0x14e   : > { %v610_v35 = vpop.eup %609  ;;  %v366_v37 = vmul.f32 %v608_v33, %v364_v21 }
 0x14f   : > { %v308_v32 = vrot.slane %v307_v31, 4  ;;  %v408_v39 = vmul.f32 %v610_v35, %v406_v24 }
 0x150   : > { %v368_v41 = vsel %vm367_vm3, %v364_v21, %v366_v37 }
 0x151   : > { %v309_v34 = vadd.f32 %v308_v32, %v307_v31  ;;  %v410_v44 = vsel %vm409_vm4, %v406_v24, %v408_v39  ;;  %v371_v45 = vsel %vm369_vm5, %v370_v42, %v368_v41 }
 0x152   : > { %v413_v48 = vsel %vm411_vm7, %v412_v46, %v410_v44 }
 0x153   : > { %v310_v36 = vrot.slane %v309_v34, 2  ;;  %v414_v49 = vadd.f32 %v413_v48, %v371_v45 }
 0x155   : > { %v311_v38 = vadd.f32 %v310_v36, %v309_v34 }
 0x157   : > { %v312_v40 = vrot.slane %v311_v38, 1 }
 0x159   : > { %v313_v43 = vadd.f32 %v312_v40, %v311_v38 }
 0x15b   : > { %v315_v47 = vmul.f32 0.0625, %v313_v43 }
 0x15d   : > { %416 = vst.msk [vmem:[%s208_s19] sm:$0x1] %vm415_vm6, %v315_v47 }
 0x15e   : > { %418 = vst.msk [vmem:[%s208_s19] sm:$0x1] %vm417_vm8, %v693_v50 }
 0x15f   : > { %420 = vst.msk [vmem:[%s208_s19] sm:$0x1] %vm419_vm9, %v414_v49 }
 0x160   : > { %624 = shalt.err (!%p621_p5)
}
 0x161   : > { %s625_s5 = scalar_lea.hbm %s800_s27, 16  ;;  %s629_s8 = scalar_lea.hbm %s849_s3, 32 }
 0x162   : > { %p626_p6 = scmp.ne.s32.totalorder %s800_s27, %s625_s5  ;;  %p630_p10 = scmp.lt.s32.totalorder %s800_s27, %s849_s3 }
 0x163   : > { %p631_p11 = scmp.lt.s32.totalorder %s629_s8, %s625_s5 }
 0x164   : > { %p627_p7 = pnand %p626_p6, %p755_p4 }
 0x165   : > { %p632_p12 = por %p631_p11, %p630_p10 }
 0x166   : > { %p628_p9 = pneg %p627_p7 }
 0x168   : > { %p633_p13 = pnand %p632_p12, %p628_p9 }
 0x16a   : > { %636 = shalt.err (!%p633_p13)
}
 0x16b   : > { %537 = dma.vmem_to_hbm [thread:$0]  (%p755_p4), %s802_s21, 16, %s800_s27, %s422_s15  }
 0x16c PF: > { %p543_p0 = scmp.ge.s32.totalorder %s687_s17, 2  ;;  %s446_s11 = sand.u32 1, %s667_s12  }
 0x16d   : > { %s447_s18 = scalar_lea.sflag [#allocation5], %s446_s11 }
 0x16e   : > { %p540_p1 = pnand %p543_p0, %p762_p8 }
 0x170   : > { %p541_p2 = pneg %p540_p1 }
 0x172   : > { %662 = dma.done.wait (%p541_p2), %s447_s18, 16  }
 0x173   : > { %664 = vsyncadd (%p541_p2), %s447_s18, 4294967280  ;;  %s16_s17 = sadd.s32 1, %s687_s17   ;;  %s852_s12 = smov %s671_s13 }
 0x174   : > { %p13_p3 = scmp.ge.s32.totalorder %s16_s17, 4   ;;  %s853_s13 = smov %s675_s14 }
 0x175   : > { %s854_s14 = smov %s768_s25  ;;  %s855_s15 = smov %s683_s16 }
 0x176   : > { %s856_s16 = smov %s858_s20  ;;  %15 = sbr.rel (!%p13_p3) target bundleno = 4 (0x4), region = 81 }
 0x17b   :  { %451 = vsyncpa [#allocation5], 1 }
 0x17c   :  { %453 = vsyncpa [#allocation5 + $0x1], 1 }

</bundles_post_ra>
